<compile_context>
chip_gen: v7x
topology: tpu7x:2x2x1
jax: 0.10.0
libtpu: 0.0.40
codegen_flags: <defaults>
</compile_context>

<pallas_src>
import functools

import jax
import jax.numpy as jnp
from jax.experimental import pallas as pl
from jax.experimental.pallas import tpu as pltpu

NEG_SLOPE = 0.01          # F.leaky_relu default negative_slope
H1, H2 = 256, 128         # hidden sizes from the PyTorch module
OUT_PAD = 128             # lane-dense padded output width (multiple of 128)
DEFAULT_TB = 512          # batch tile when B is large (sized for v7x 64MiB VMEM)


def _leaky_relu(x):
    return jnp.where(x > 0, x, NEG_SLOPE * x)


def actor_kernel(x_ref, w1_ref, b1_ref, w2_ref, b2_ref, w3_ref, b3_ref, o_ref):
    # Layer 1: bf16 MXU operands, f32 accumulate; elementwise in f32.
    h = jnp.dot(x_ref[...], w1_ref[...], preferred_element_type=jnp.float32)
    h = _leaky_relu(h + b1_ref[...])
    # Layer 2.
    h = jnp.dot(h.astype(w2_ref.dtype), w2_ref[...],
                preferred_element_type=jnp.float32)
    h = _leaky_relu(h + b2_ref[...])
    # Layer 3: output lanes padded to OUT_PAD -> unmasked full-lane stores.
    h = jnp.dot(h.astype(w3_ref.dtype), w3_ref[...],
                preferred_element_type=jnp.float32)
    o_ref[...] = jnp.tanh(h + b3_ref[...]).astype(o_ref.dtype)


def prepare_actor_params(params, matmul_dtype=jnp.bfloat16):
    """One-time prep: cast matmul weights to bf16, zero-pad w3/b3 to OUT_PAD lanes."""
    nA = params["w3"].shape[1]
    w3p = jnp.zeros((H2, OUT_PAD), params["w3"].dtype).at[:, :nA].set(params["w3"])
    b3p = jnp.zeros((1, OUT_PAD), params["b3"].dtype).at[:, :nA].set(params["b3"])
    return dict(
        w1=params["w1"].astype(matmul_dtype),
        w2=params["w2"].astype(matmul_dtype),
        w3=w3p.astype(matmul_dtype),
        b1=params["b1"].astype(jnp.float32),
        b2=params["b2"].astype(jnp.float32),
        b3=b3p.astype(jnp.float32),
    )


@functools.partial(jax.jit, static_argnames=("nA", "tb"))
def actor_forward(state, params, nA, tb=DEFAULT_TB):
    """state: [B, nS] float32.  params: output of prepare_actor_params."""
    B, nS = state.shape
    x = state.astype(params["w1"].dtype)   # bf16 MXU operand

    # Batch tiling: single full block for small B, 512-row tiles for large B
    # (weights stay VMEM-resident across the whole grid).
    if B <= tb:
        TB, Bp = B, B
    else:
        TB = tb
        Bp = -(-B // TB) * TB
        if Bp != B:
            x = jnp.pad(x, ((0, Bp - B), (0, 0)))
    grid = (Bp // TB,)

    vmem = pltpu.MemorySpace.VMEM
    flops = 2 * Bp * (nS * H1 + H1 * H2 + H2 * OUT_PAD)
    bytes_accessed = (
        x.size * x.dtype.itemsize
        + sum(params[k].size * params[k].dtype.itemsize
              for k in ("w1", "b1", "w2", "b2", "w3", "b3"))
        + Bp * OUT_PAD * 4
    )

    out_padded = pl.pallas_call(
        actor_kernel,
        out_shape=jax.ShapeDtypeStruct((Bp, OUT_PAD), jnp.float32),
        grid=grid,
        in_specs=[
            pl.BlockSpec((TB, nS), lambda i: (i, 0), memory_space=vmem),      # x
            pl.BlockSpec((nS, H1), lambda i: (0, 0), memory_space=vmem),      # w1
            pl.BlockSpec((1, H1), lambda i: (0, 0), memory_space=vmem),       # b1
            pl.BlockSpec((H1, H2), lambda i: (0, 0), memory_space=vmem),      # w2
            pl.BlockSpec((1, H2), lambda i: (0, 0), memory_space=vmem),       # b2
            pl.BlockSpec((H2, OUT_PAD), lambda i: (0, 0), memory_space=vmem), # w3 (padded)
            pl.BlockSpec((1, OUT_PAD), lambda i: (0, 0), memory_space=vmem),  # b3 (padded)
        ],
        out_specs=pl.BlockSpec((TB, OUT_PAD), lambda i: (i, 0), memory_space=vmem),
        compiler_params=pltpu.CompilerParams(dimension_semantics=("parallel",)),
        cost_estimate=pl.CostEstimate(
            flops=flops,
            transcendentals=Bp * OUT_PAD,
            bytes_accessed=bytes_accessed,
        ),
    )(x, params["w1"], params["b1"], params["w2"], params["b2"],
      params["w3"], params["b3"])

    return out_padded[:B, :nA]


def init_actor_params(key, nS, nA):
    """Deterministic init mirroring Actor.reset_parameters():
       dense1/dense2 weights ~ U(-1/sqrt(out_features), ...) (faithful to the
       reference's hidden_init quirk), dense3 ~ U(-3e-3, 3e-3)."""
    k1, k2, k3, kb1, kb2, kb3 = jax.random.split(key, 6)

    lim1 = 1.0 / jnp.sqrt(jnp.float32(H1))
    lim2 = 1.0 / jnp.sqrt(jnp.float32(H2))

    w1 = jax.random.uniform(k1, (nS, H1), jnp.float32, -lim1, lim1)
    w2 = jax.random.uniform(k2, (H1, H2), jnp.float32, -lim2, lim2)
    w3 = jax.random.uniform(k3, (H2, nA), jnp.float32, -3e-3, 3e-3)

    # PyTorch Linear default bias init: U(-1/sqrt(in_features), 1/sqrt(in_features)).
    b1 = jax.random.uniform(kb1, (1, H1), jnp.float32,
                            -1.0 / jnp.sqrt(jnp.float32(nS)), 1.0 / jnp.sqrt(jnp.float32(nS)))
    b2 = jax.random.uniform(kb2, (1, H2), jnp.float32,
                            -1.0 / jnp.sqrt(jnp.float32(H1)), 1.0 / jnp.sqrt(jnp.float32(H1)))
    b3 = jax.random.uniform(kb3, (1, nA), jnp.float32,
                            -1.0 / jnp.sqrt(jnp.float32(H2)), 1.0 / jnp.sqrt(jnp.float32(H2)))
    return dict(w1=w1, b1=b1, w2=w2, b2=b2, w3=w3, b3=b3)


def actor_reference(state, p, matmul_dtype=jnp.float32):
    def lin(x, w, b):
        return jnp.dot(x.astype(matmul_dtype), w.astype(matmul_dtype),
                       preferred_element_type=jnp.float32) + b
    h1 = _leaky_relu(lin(state, p["w1"], p["b1"]))
    h2 = _leaky_relu(lin(h1, p["w2"], p["b2"]))
    return jnp.tanh(lin(h2, p["w3"], p["b3"]))


if __name__ == "__main__":
    B, nS, nA = 8, 32, 4
    key = jax.random.PRNGKey(0)
    kx, kp = jax.random.split(key)

    state = jax.random.normal(kx, (B, nS), jnp.float32)
    raw_params = init_actor_params(kp, nS, nA)
    params = prepare_actor_params(raw_params)

    # Small-batch path (single block, no grid loop).
    out = actor_forward(state, params, nA=nA)
    out = jax.block_until_ready(out)

    ref_bf16 = actor_reference(state, raw_params, matmul_dtype=jnp.bfloat16)
    ref_f32 = actor_reference(state, raw_params, matmul_dtype=jnp.float32)
    assert out.shape == (B, nA)
    assert jnp.allclose(out, ref_bf16, atol=1e-3, rtol=1e-3), float(jnp.max(jnp.abs(out - ref_bf16)))
    assert jnp.allclose(out, ref_f32, atol=2e-2, rtol=0.0), float(jnp.max(jnp.abs(out - ref_f32)))

    # Medium-batch path: exercises the batch-tiled grid (TB=512, padded B).
    B2 = 1056
    state2 = jax.random.normal(jax.random.PRNGKey(1), (B2, nS), jnp.float32)
    out2 = jax.block_until_ready(actor_forward(state2, params, nA=nA))
    ref2 = actor_reference(state2, raw_params, matmul_dtype=jnp.bfloat16)
    assert out2.shape == (B2, nA)
    assert jnp.allclose(out2, ref2, atol=1e-3, rtol=1e-3), float(jnp.max(jnp.abs(out2 - ref2)))

    print("KERNEL_OK")
</pallas_src>

<mosaic_0001>
module attributes {stable_mosaic.version = 11 : i64} {
  func.func @actor_kernel(%arg0: i32, %arg1: memref<8x32xbf16, #tpu.memory_space<vmem>>, %arg2: memref<32x256xbf16, #tpu.memory_space<vmem>>, %arg3: memref<1x256xf32, #tpu.memory_space<vmem>>, %arg4: memref<256x128xbf16, #tpu.memory_space<vmem>>, %arg5: memref<1x128xf32, #tpu.memory_space<vmem>>, %arg6: memref<128x128xbf16, #tpu.memory_space<vmem>>, %arg7: memref<1x128xf32, #tpu.memory_space<vmem>>, %arg8: memref<8x128xf32, #tpu.memory_space<vmem>>) attributes {dimension_semantics = [#tpu.dimension_semantics<parallel>], iteration_bounds = array<i64: 1>, scalar_prefetch = 0 : i64, scratch_operands = 0 : i64, tpu.core_type = #tpu.core_type<tc>, window_params = [{transform_indices = @transform_0, window_bounds = array<i64: 8, 32>}, {pipeline_mode = #tpu.pipeline_mode<synchronous>, transform_indices = @transform_1, window_bounds = array<i64: 32, 256>}, {pipeline_mode = #tpu.pipeline_mode<synchronous>, transform_indices = @transform_2, window_bounds = array<i64: 1, 256>}, {pipeline_mode = #tpu.pipeline_mode<synchronous>, transform_indices = @transform_3, window_bounds = array<i64: 256, 128>}, {pipeline_mode = #tpu.pipeline_mode<synchronous>, transform_indices = @transform_4, window_bounds = array<i64: 1, 128>}, {pipeline_mode = #tpu.pipeline_mode<synchronous>, transform_indices = @transform_5, window_bounds = array<i64: 128, 128>}, {pipeline_mode = #tpu.pipeline_mode<synchronous>, transform_indices = @transform_6, window_bounds = array<i64: 1, 128>}, {transform_indices = @transform_7, window_bounds = array<i64: 8, 128>}]} {
    %c0 = arith.constant 0 : index
    %c0_0 = arith.constant 0 : index
    %0 = vector.load %arg1[%c0, %c0_0] : memref<8x32xbf16, #tpu.memory_space<vmem>>, vector<8x32xbf16>
    %c0_1 = arith.constant 0 : index
    %c0_2 = arith.constant 0 : index
    %1 = vector.load %arg2[%c0_1, %c0_2] : memref<32x256xbf16, #tpu.memory_space<vmem>>, vector<32x256xbf16>
    %cst = arith.constant dense<0.000000e+00> : vector<8x256xf32>
    %2 = tpu.matmul %0, %1, %cst {dimension_numbers = #tpu.dot_dimension_numbers<[1], [0], [0], [1], [0, 0, 1, 1], [], []>} : vector<8x32xbf16>, vector<32x256xbf16>, vector<8x256xf32> -> vector<8x256xf32>
    %c0_3 = arith.constant 0 : index
    %c0_4 = arith.constant 0 : index
    %3 = vector.load %arg3[%c0_3, %c0_4] : memref<1x256xf32, #tpu.memory_space<vmem>>, vector<1x256xf32>
    %4 = vector.broadcast %3 : vector<1x256xf32> to vector<8x256xf32>
    %5 = arith.addf %2, %4 : vector<8x256xf32>
    %cst_5 = arith.constant 0.000000e+00 : f32
    %6 = vector.broadcast %cst_5 : f32 to vector<8x256xf32>
    %7 = arith.cmpf ogt, %5, %6 : vector<8x256xf32>
    %cst_6 = arith.constant 0.00999999977 : f32
    %8 = vector.broadcast %cst_6 : f32 to vector<8x256xf32>
    %9 = arith.mulf %8, %5 : vector<8x256xf32>
    %10 = arith.select %7, %5, %9 : vector<8x256xi1>, vector<8x256xf32>
    %11 = arith.truncf %10 : vector<8x256xf32> to vector<8x256xbf16>
    %c0_7 = arith.constant 0 : index
    %c0_8 = arith.constant 0 : index
    %12 = vector.load %arg4[%c0_7, %c0_8] : memref<256x128xbf16, #tpu.memory_space<vmem>>, vector<256x128xbf16>
    %cst_9 = arith.constant dense<0.000000e+00> : vector<8x128xf32>
    %13 = tpu.matmul %11, %12, %cst_9 {dimension_numbers = #tpu.dot_dimension_numbers<[1], [0], [0], [1], [0, 0, 1, 1], [], []>} : vector<8x256xbf16>, vector<256x128xbf16>, vector<8x128xf32> -> vector<8x128xf32>
    %c0_10 = arith.constant 0 : index
    %c0_11 = arith.constant 0 : index
    %14 = vector.load %arg5[%c0_10, %c0_11] : memref<1x128xf32, #tpu.memory_space<vmem>>, vector<1x128xf32>
    %15 = vector.broadcast %14 : vector<1x128xf32> to vector<8x128xf32>
    %16 = arith.addf %13, %15 : vector<8x128xf32>
    %cst_12 = arith.constant 0.000000e+00 : f32
    %17 = vector.broadcast %cst_12 : f32 to vector<8x128xf32>
    %18 = arith.cmpf ogt, %16, %17 : vector<8x128xf32>
    %cst_13 = arith.constant 0.00999999977 : f32
    %19 = vector.broadcast %cst_13 : f32 to vector<8x128xf32>
    %20 = arith.mulf %19, %16 : vector<8x128xf32>
    %21 = arith.select %18, %16, %20 : vector<8x128xi1>, vector<8x128xf32>
    %22 = arith.truncf %21 : vector<8x128xf32> to vector<8x128xbf16>
    %c0_14 = arith.constant 0 : index
    %c0_15 = arith.constant 0 : index
    %23 = vector.load %arg6[%c0_14, %c0_15] : memref<128x128xbf16, #tpu.memory_space<vmem>>, vector<128x128xbf16>
    %cst_16 = arith.constant dense<0.000000e+00> : vector<8x128xf32>
    %24 = tpu.matmul %22, %23, %cst_16 {dimension_numbers = #tpu.dot_dimension_numbers<[1], [0], [0], [1], [0, 0, 1, 1], [], []>} : vector<8x128xbf16>, vector<128x128xbf16>, vector<8x128xf32> -> vector<8x128xf32>
    %c0_17 = arith.constant 0 : index
    %c0_18 = arith.constant 0 : index
    %25 = vector.load %arg7[%c0_17, %c0_18] : memref<1x128xf32, #tpu.memory_space<vmem>>, vector<1x128xf32>
    %26 = vector.broadcast %25 : vector<1x128xf32> to vector<8x128xf32>
    %27 = arith.addf %24, %26 : vector<8x128xf32>
    %28 = math.tanh %27 : vector<8x128xf32>
    %c0_19 = arith.constant 0 : index
    %c0_20 = arith.constant 0 : index
    %29 = vector.load %arg8[%c0_19, %c0_20] : memref<8x128xf32, #tpu.memory_space<vmem>>, vector<8x128xf32>
    tpu.vector_store %arg8[%c0_19, %c0_20], %28 {strides = array<i32>} : memref<8x128xf32, #tpu.memory_space<vmem>>, vector<8x128xf32>,
    return
  }
  func.func @transform_0(%arg0: i32) -> (i32, i32) {
    %c0_i32 = arith.constant 0 : i32
    %c0_i32_0 = arith.constant 0 : i32
    return %arg0, %c0_i32 : i32, i32
  }
  func.func @transform_1(%arg0: i32) -> (i32, i32) {
    %c0_i32 = arith.constant 0 : i32
    %c0_i32_0 = arith.constant 0 : i32
    %c0_i32_1 = arith.constant 0 : i32
    return %c0_i32, %c0_i32_0 : i32, i32
  }
  func.func @transform_2(%arg0: i32) -> (i32, i32) {
    %c0_i32 = arith.constant 0 : i32
    %c0_i32_0 = arith.constant 0 : i32
    %c0_i32_1 = arith.constant 0 : i32
    return %c0_i32, %c0_i32_0 : i32, i32
  }
  func.func @transform_3(%arg0: i32) -> (i32, i32) {
    %c0_i32 = arith.constant 0 : i32
    %c0_i32_0 = arith.constant 0 : i32
    %c0_i32_1 = arith.constant 0 : i32
    return %c0_i32, %c0_i32_0 : i32, i32
  }
  func.func @transform_4(%arg0: i32) -> (i32, i32) {
    %c0_i32 = arith.constant 0 : i32
    %c0_i32_0 = arith.constant 0 : i32
    %c0_i32_1 = arith.constant 0 : i32
    return %c0_i32, %c0_i32_0 : i32, i32
  }
  func.func @transform_5(%arg0: i32) -> (i32, i32) {
    %c0_i32 = arith.constant 0 : i32
    %c0_i32_0 = arith.constant 0 : i32
    %c0_i32_1 = arith.constant 0 : i32
    return %c0_i32, %c0_i32_0 : i32, i32
  }
  func.func @transform_6(%arg0: i32) -> (i32, i32) {
    %c0_i32 = arith.constant 0 : i32
    %c0_i32_0 = arith.constant 0 : i32
    %c0_i32_1 = arith.constant 0 : i32
    return %c0_i32, %c0_i32_0 : i32, i32
  }
  func.func @transform_7(%arg0: i32) -> (i32, i32) {
    %c0_i32 = arith.constant 0 : i32
    %c0_i32_0 = arith.constant 0 : i32
    return %arg0, %c0_i32 : i32, i32
  }
}

</mosaic_0001>

<bundles_post_ra>
// kernel: actor_forward.1
= control target key start
LH: loop header
LB: loop body
LE: loop exit
PB: predicated region body
PF: predicated region fallthrough
CT: control target
= control target key end

     0   :  { %12 = vsyncpa [#allocation3], 0  ;;  %s757_s0 = inlined_call_operand.vmem [shape: bf16[8,32], index: 0, kind: input, shape index: {}]   ;;  %s758_s1 = inlined_call_operand.hbm [shape: bf16[32,256], index: 1, kind: input, shape index: {}]   ;;  %s759_s2 = inlined_call_operand.vmem [shape: f32[1,256], index: 2, kind: input, shape index: {}]   ;;  %s760_s3 = inlined_call_operand.hbm [shape: bf16[256,128], index: 3, kind: input, shape index: {}]   ;;  %s761_s4 = inlined_call_operand.vmem [shape: f32[1,128], index: 4, kind: input, shape index: {}]   ;;  %s762_s5 = inlined_call_operand.hbm [shape: bf16[128,128], index: 5, kind: input, shape index: {}]   ;;  %s763_s6 = inlined_call_operand.vmem [shape: f32[1,128], index: 6, kind: input, shape index: {}]   ;;  %s764_s7 = inlined_call_operand.vmem [shape: f32[8,128], index: 7, kind: output, shape index: {}]  }
   0x1   :  { %13 = vsyncpa [#allocation5], 0  ;;  %s650_s24 = smov [#allocation4]   ;;  %s580_s28 = scalar_lea.hbm %s760_s3, 2048 }
   0x2   :  { %s35_s25 = sshll.u32 %s650_s24, 4  ;;  %p581_p0 = scmp.ne.s32.totalorder %s760_s3, %s580_s28  ;;  %s36_s25 = int_to_ptr.vmem [resolvable:$true] %s35_s25 }
   0x3   :  { %p584_p1 = scmp.lt.u32.totalorder %s580_s28, %s760_s3 }
   0x5   :  { %p586_p2 = pnand %p584_p1, %p581_p0 }
   0x7   :  { %589 = shalt.err (!%p586_p2)
}
   0x8   :  { %s590_s10 = scalar_lea.vmem %s36_s25, 2048  ;;  %p595_p4 = scmp.lt.s32.totalorder %s36_s25, %s36_s25 }
   0x9   :  { %p591_p3 = scmp.ne.s32.totalorder %s36_s25, %s590_s10  ;;  %p596_p5 = scmp.lt.s32.totalorder %s590_s10, %s590_s10 }
   0xb   :  { %p597_p6 = por %p596_p5, %p595_p4 }
   0xd   :  { %p598_p7 = pnand %p597_p6, %p591_p3 }
   0xf   :  { %601 = shalt.err (!%p598_p7)
}
  0x10   :  { %s651_s11 = smov 64   ;;  %s652_s12 = smov 4  }
  0x11   :  { %41 = dma.hbm_to_vmem [thread:$0]  %s760_s3, 2048, %s36_s25, [#allocation5], %s651_s11, %s651_s11, %s652_s12  }
  0x12   :  { %s653_s15 = smov [#allocation2]   ;;  %s602_s19 = scalar_lea.hbm %s758_s1, 512 }
  0x13   :  { %s21_s16 = sshll.u32 %s653_s15, 4  ;;  %p603_p8 = scmp.ne.s32.totalorder %s758_s1, %s602_s19  ;;  %s22_s16 = int_to_ptr.vmem [resolvable:$true] %s21_s16 }
  0x14   :  { %p606_p9 = scmp.lt.u32.totalorder %s602_s19, %s758_s1 }
  0x16   :  { %p608_p10 = pnand %p606_p9, %p603_p8 }
  0x18   :  { %611 = shalt.err (!%p608_p10)
}
  0x19   :  { %s612_s24 = scalar_lea.vmem %s22_s16, 512  ;;  %p617_p12 = scmp.lt.s32.totalorder %s22_s16, %s22_s16 }
  0x1a   :  { %p613_p11 = scmp.ne.s32.totalorder %s22_s16, %s612_s24  ;;  %p618_p13 = scmp.lt.s32.totalorder %s612_s24, %s612_s24 }
  0x1c   :  { %p619_p0 = por %p618_p13, %p617_p12 }
  0x1e   :  { %p620_p1 = pnand %p619_p0, %p613_p11 }
  0x20   :  { %623 = shalt.err (!%p620_p1)
}
  0x21   :  { %s654_s3 = smov 128   ;;  %s655_s25 = smov 8  }
  0x22   :  { %27 = dma.hbm_to_vmem [thread:$0]  %s758_s1, 512, %s22_s16, [#allocation3], %s654_s3, %s654_s3, %s655_s25  }
  0x23   :  { %s656_s28 = smov [#allocation6]   ;;  %s624_s9 = scalar_lea.hbm %s762_s5, 1024 }
  0x24   :  { %s49_s29 = sshll.u32 %s656_s28, 4  ;;  %p625_p2 = scmp.ne.s32.totalorder %s762_s5, %s624_s9  ;;  %s50_s29 = int_to_ptr.vmem [resolvable:$true] %s49_s29 }
  0x25   :  { %p628_p3 = scmp.lt.u32.totalorder %s624_s9, %s762_s5 }
  0x27   :  { %p630_p4 = pnand %p628_p3, %p625_p2 }
  0x29   :  { %633 = shalt.err (!%p630_p4)
}
  0x2a   :  { %s634_s17 = scalar_lea.vmem %s50_s29, 1024  ;;  %p639_p6 = scmp.lt.s32.totalorder %s50_s29, %s50_s29 }
  0x2b   :  { %p635_p5 = scmp.ne.s32.totalorder %s50_s29, %s634_s17  ;;  %p640_p7 = scmp.lt.s32.totalorder %s634_s17, %s634_s17 }
  0x2d   :  { %p641_p8 = por %p640_p7, %p639_p6 }
  0x2f   :  { %p642_p9 = pnand %p641_p8, %p635_p5 }
  0x31   :  { %645 = shalt.err (!%p642_p9)
}
  0x32   :  { %55 = dma.hbm_to_vmem [thread:$0]  %s762_s5, 1024, %s50_s29, [#allocation5], %s651_s11, %s651_s11, %s652_s12  }
  0x33   :  { %646 = dma.done.wait [#allocation3], 512  }
  0x34   :  { %647 = vsyncadd [#allocation3], 4294966784 }
  0x35   :  { %648 = dma.done.wait [#allocation5], 3072  }
  0x36   :  { %649 = vsyncadd [#allocation5], 4294964224  ;;  %v657_v0 = vmov 0   ;;  %v548_v1 = vld [vmem:[#allocation2 + $0x4] ss:$8 sps:$4 sm:$0xff]   ;;  %vm105_vm0 = vcmask 261120   ;;  %v75_v28 = vlaneseq }
  0x37   :  { %141 = vmatprep.mubr.bf16.mxu0 %v657_v0  ;;  %v550_v2 = vld [vmem:[#allocation2] ss:$8 sps:$4 sm:$0xff]   ;;  %109 = vmatprep.subr.bf16.mxu0 %v548_v1  ;;  %v551_v3 = vld [vmem:[#allocation2 + $0x14] ss:$8 sps:$4 sm:$0xff]   ;;  %v553_v4 = vld [vmem:[#allocation2 + $0x10] ss:$8 sps:$4 sm:$0xff]  }
  0x38   :  { %110 = vmatpush1.bf16.msra.mxu0 %v550_v2  ;;  %v554_v5 = vld [vmem:[#allocation4 + $0x40] sm:$0xff]   ;;  %v556_v8 = vld [vmem:[#allocation4 + $0x48] sm:$0xff]   ;;  %v558_v10 = vld [vmem:[#allocation4 + $0x50] sm:$0xff]   ;;  %v658_v23 = vmov 0.0   ;;  %v76_v29 = vshrl.u32 %v75_v28, 7  ;;  %vm659_vm3 = vmmov 0  }
  0x39   :  { %111 = vmatprep.subr.bf16.mxu0 %v551_v3  ;;  %v555_v6 = vld [vmem:[#allocation4] sm:$0xff]   ;;  %487 = vmatprep.subr.bf16.mxu1 %v554_v5  ;;  %v557_v9 = vld [vmem:[#allocation4 + $0x8] sm:$0xff]   ;;  %v559_v11 = vld [vmem:[#allocation4 + $0x10] sm:$0xff]  }
  0x3a   :  { %v68_v7 = vld [vmem:[%s757_s0] sm:$0xf]  ;;  %488 = vmatpush3.bf16.msra.mxu1 %v555_v6  ;;  %v560_v12 = vld [vmem:[#allocation4 + $0x58] sm:$0xff]   ;;  %v564_v16 = vld [vmem:[#allocation4 + $0x68] sm:$0xff]   ;;  %v77_v30 = vsub.s32 0, %v76_v29  ;;  %v81_v32 = vsub.s32 1, %v76_v29 }
  0x3b   :  { %489 = vmatprep.subr.bf16.mxu1 %v556_v8  ;;  %v561_v13 = vld [vmem:[#allocation4 + $0x18] sm:$0xff]   ;;  %v562_v14 = vld [vmem:[#allocation4 + $0x60] sm:$0xff]   ;;  %v565_v17 = vld [vmem:[#allocation4 + $0x28] sm:$0xff]  }
  0x3c   :  { %112 = vmatpush1.bf16.msra.mxu0 %v553_v4  ;;  %v563_v15 = vld [vmem:[#allocation4 + $0x20] sm:$0xff]   ;;  %v566_v18 = vld [vmem:[#allocation4 + $0x70] sm:$0xff]   ;;  %v568_v20 = vld [vmem:[#allocation4 + $0x78] sm:$0xff]  }
  0x3d   :  { %v567_v19 = vld [vmem:[#allocation4 + $0x30] sm:$0xff]   ;;  %v569_v21 = vld [vmem:[#allocation4 + $0x38] sm:$0xff]   ;;  %v570_v22 = vld [vmem:[#allocation6] sm:$0xff]   ;;  %518 = vmatprep.subr.bf16.mxu0 %v658_v23 }
  0x3e   :  { %490 = vmatpush3.bf16.msra.mxu1 %v557_v9  ;;  %v571_v24 = vld [vmem:[#allocation6 + $0x8] sm:$0xff]   ;;  %v572_v25 = vld [vmem:[#allocation6 + $0x10] sm:$0xff]   ;;  %v573_v26 = vld [vmem:[#allocation6 + $0x18] sm:$0xff]  }
  0x3f   :  { %460 = vmatmul.mubr.msk.bf16.vlgmr.msra.gmra.mrb[0].mxu0 %vm105_vm0, %v68_v7  ;;  %491 = vmatprep.subr.bf16.mxu1 %v558_v10  ;;  %v574_v27 = vld [vmem:[#allocation6 + $0x20] sm:$0xff]   ;;  %v575_v47 = vld [vmem:[#allocation6 + $0x28] sm:$0xff]   ;;  %v576_v48 = vld [vmem:[#allocation6 + $0x30] sm:$0xff]  }
  0x40   :  { %519 = vmatpush3.bf16.msra.mxu0 %v570_v22  ;;  %v73_v31 = vld [vmem:[%s759_s2] sm:$0x3]  ;;  %v577_v49 = vld [vmem:[#allocation6 + $0x38] sm:$0xff]   ;;  %534 = vmatprep.mubr.msk.bf16.mxu0 %vm659_vm3, %v658_v23 }
  0x41   :  { %520 = vmatprep.subr.bf16.mxu0 %v658_v23  ;;  %v78_v33 = vrot.slane %v73_v31, %v77_v30  ;;  %v82_v34 = vrot.slane %v73_v31, %v81_v32  ;;  %v461_v51 = vld [vmem:[%s761_s4] ss:$0 sm:$0xff] }
  0x42   :  { %492 = vmatpush3.bf16.msra.mxu1 %v559_v11  ;;  %v478_v60 = vld [vmem:[%s763_s6] ss:$0 sm:$0xff] }
  0x43   :  { %493 = vmatprep.subr.bf16.mxu1 %v560_v12 }
  0x44   :  { %521 = vmatpush3.bf16.msra.mxu0 %v571_v24 }
  0x45   :  { %522 = vmatprep.subr.bf16.mxu0 %v658_v23 }
  0x46   :  { %494 = vmatpush3.bf16.msra.mxu1 %v561_v13 }
  0x47   :  { %495 = vmatprep.subr.bf16.mxu1 %v562_v14 }
  0x48   :  { %523 = vmatpush3.bf16.msra.mxu0 %v572_v25 }
  0x49   :  { %524 = vmatprep.subr.bf16.mxu0 %v658_v23 }
  0x4a   :  { %496 = vmatpush3.bf16.msra.mxu1 %v563_v15 }
  0x4b   :  { %497 = vmatprep.subr.bf16.mxu1 %v564_v16 }
  0x4c   :  { %525 = vmatpush3.bf16.msra.mxu0 %v573_v26 }
  0x4d   :  { %526 = vmatprep.subr.bf16.mxu0 %v658_v23 }
  0x4e   :  { %498 = vmatpush3.bf16.msra.mxu1 %v565_v17 }
  0x4f   :  { %499 = vmatprep.subr.bf16.mxu1 %v566_v18 }
  0x50   :  { %527 = vmatpush3.bf16.msra.mxu0 %v574_v27 }
  0x51   :  { %528 = vmatprep.subr.bf16.mxu0 %v658_v23 }
  0x52   :  { %500 = vmatpush3.bf16.msra.mxu1 %v567_v19 }
  0x53   :  { %501 = vmatprep.subr.bf16.mxu1 %v568_v20 }
  0x54   :  { %529 = vmatpush3.bf16.msra.mxu0 %v575_v47 }
  0x55   :  { %530 = vmatprep.subr.bf16.mxu0 %v658_v23 }
  0x56   :  { %502 = vmatpush3.bf16.msra.mxu1 %v569_v21 }
  0x58   :  { %531 = vmatpush3.bf16.msra.mxu0 %v576_v48 }
  0x59   :  { %532 = vmatprep.subr.bf16.mxu0 %v658_v23 }
  0x5c   :  { %533 = vmatpush3.bf16.msra.mxu0 %v577_v49 }
 0x112   :  { %v143_v35 = vpop.f32.mrb[0].mxu0 }
 0x113   :  { %v144_v36 = vadd.f32 %v143_v35, %v78_v33  ;;  %v145_v37 = vpop.f32.mrb[1].mxu0 }
 0x114   :  { %v146_v38 = vadd.f32 %v145_v37, %v82_v34  ;;  %v147_v39 = vpop.f32.mrb[2].mxu0 }
 0x115   :  { %vm150_vm1 = vcmp.gt.f32.partialorder %v144_v36, 0.0  ;;  %v152_v40 = vmul.f32 0.01, %v144_v36  ;;  %v148_v41 = vpop.f32.mrb[3].mxu0 }
 0x116   :  { %vm151_vm2 = vcmp.gt.f32.partialorder %v146_v38, 0.0  ;;  %v153_v42 = vmul.f32 0.01, %v146_v38 }
 0x117   :  { %v154_v43 = vsel %vm150_vm1, %v144_v36, %v152_v40 }
 0x118   :  { %v155_v44 = vsel %vm151_vm2, %v146_v38, %v153_v42  ;;  %v156_v46 = vpack.c.bf16 %v154_v43, %v154_v43 }
 0x119   :  { %v157_v45 = vpack.c.bf16 %v155_v44, %v155_v44 }
 0x11b   :  { %325 = vmatprep.mubr.bf16.mxu1 %v157_v45 }
 0x11c   :  { %326 = vmatmul.mubr.bf16.vlgmr.msra.gmra.mrb[0].mxu1 %v156_v46 }
 0x1ef   :  { %v503_v50 = vpop.f32.mrb[0].mxu1 }
 0x1f0   :  { %v504_v52 = vpop.f32.mrb[1].mxu1 }
 0x1f1   :  { %v505_v53 = vadd.f32 %v504_v52, %v503_v50  ;;  %v506_v54 = vpop.f32.mrb[2].mxu1 }
 0x1f2   :  { %v507_v55 = vpop.f32.mrb[3].mxu1 }
 0x1f3   :  { %v328_v56 = vadd.f32 %v505_v53, %v461_v51 }
 0x1f5   :  { %vm333_vm4 = vcmp.gt.f32.partialorder %v328_v56, 0.0  ;;  %v334_v57 = vmul.f32 0.01, %v328_v56 }
 0x1f7   :  { %v335_v58 = vsel %vm333_vm4, %v328_v56, %v334_v57 }
 0x1f8   :  { %v336_v59 = vpack.c.bf16 %v335_v58, %v335_v58 }
 0x1fa   :  { %535 = vmatmul.mubr.bf16.vlgmr.msra.gmra.mrb[4].mxu0 %v336_v59 }
 0x2cd   :  { %v442_v61 = vpop.f32.mrb[4].mxu0 }
 0x2ce   :  { %v443_v62 = vadd.f32 %v478_v60, %v442_v61  ;;  %v536_v63 = vpop.f32.mrb[5].mxu0 }
 0x2cf   :  { %v445_v0 = vpop.f32.mrb[6].mxu0 }
 0x2d0   :  { %578 = vtanh.f32 %v443_v62  ;;  %v537_v1 = vpop.f32.mrb[7].mxu0 }
 0x2da   :  { %v579_v2 = vpop.eup %578 }
 0x2db   :  { %449 = vst [vmem:[%s764_s7] sm:$0xff] %v579_v2 }
 0x2dc   :  { %454 = vsyncpa [#allocation3], 1 }
 0x2dd   :  { %455 = vsyncpa [#allocation5], 1 }

</bundles_post_ra>
